<compile_context>
chip_gen: v5e
topology: v5e:2x2
jax: 0.10.0
libtpu: 0.0.40
codegen_flags: <defaults>
</compile_context>

<pallas_src>
import jax
import jax.numpy as jnp
from jax.experimental import pallas as pl
from jax.experimental.pallas import tpu as pltpu


# --------------------------------------------------------------------------
# Primary path: identity with zero kernel-side data movement.
# --------------------------------------------------------------------------
def _noop_kernel(x_ref, o_ref):
    # Output HBM buffer is aliased to the input buffer, so it already holds
    # the correct bytes; nothing to compute, nothing to move.
    del x_ref, o_ref


def classifier_forward(x):
    """Identity forward: no-op aliased pallas_call (zero HBM traffic when donated)."""
    if x.size == 0:
        return x
    return pl.pallas_call(
        _noop_kernel,
        out_shape=jax.ShapeDtypeStruct(x.shape, x.dtype),
        in_specs=[pl.BlockSpec(memory_space=pl.ANY)],
        out_specs=pl.BlockSpec(memory_space=pl.ANY),
        input_output_aliases={0: 0},
        compiler_params=pltpu.CompilerParams(has_side_effects=True),
    )(x)


# --------------------------------------------------------------------------
# Secondary path: materializing tiled copy (fresh output buffer).
# --------------------------------------------------------------------------
_TARGET_BLOCK_BYTES = 4 * 1024 * 1024   # 4 MiB/block -> ~16 MiB resident (2x in + 2x out)
_VMEM_LIMIT_BYTES = 32 * 1024 * 1024    # under v7x's 64 MiB physical; raises v5e's 16 MiB default


def _copy_kernel(x_ref, o_ref):
    o_ref[...] = x_ref[...]


def classifier_forward_copy(x):
    """Identity forward that materializes a new buffer via a tiled Pallas copy."""
    orig_shape = x.shape
    total = x.size
    if total == 0:
        return x

    itemsize = jnp.dtype(x.dtype).itemsize
    sublane = 8 * max(1, 4 // itemsize)        # 8 (f32), 16 (bf16), 32 (int8)

    compiler_params = pltpu.CompilerParams(
        dimension_semantics=("parallel",),     # only changes codegen on v7x (2 TCs)
        vmem_limit_bytes=_VMEM_LIMIT_BYTES,
    )

    # ---- lane-dense factorization: cols a multiple of 128, prefer sublane-aligned rows.
    candidates = [c for c in (8192, 4096, 2048, 1024, 512, 256, 128) if total % c == 0]
    cols = None
    for c in candidates:
        if total // c >= sublane:
            cols = c
            break
    if cols is None and candidates:
        cols = candidates[0]                   # tiny tensor: a single small block anyway

    if cols is not None:
        rows = total // cols
        x2d = x.reshape(rows, cols)
        row_bytes = cols * itemsize
        tr = max(1, _TARGET_BLOCK_BYTES // row_bytes)
        if tr >= rows:
            tr = rows                          # full extent: (8,128) rule not applied
        else:
            tr = max(sublane, (tr // sublane) * sublane)
        grid = (pl.cdiv(rows, tr),)
        out2d = pl.pallas_call(
            _copy_kernel,
            out_shape=jax.ShapeDtypeStruct((rows, cols), x.dtype),
            grid_spec=pltpu.PrefetchScalarGridSpec(
                num_scalar_prefetch=0,
                grid=grid,
                in_specs=[pl.BlockSpec((tr, cols), lambda i: (i, 0))],
                out_specs=pl.BlockSpec((tr, cols), lambda i: (i, 0)),
            ),
            compiler_params=compiler_params,
        )(x2d)
        return out2d.reshape(orig_shape)

    # ---- bounded fallback (no divisor that is a multiple of 128): tile the lane axis.
    x2d = x.reshape(1, total)
    tc = _TARGET_BLOCK_BYTES // itemsize
    if tc >= total:
        tc = total                             # full-extent block (no (8,128) constraint)
    else:
        tc = max(128, (tc // 128) * 128)       # multiple of 128; ragged tail block is handled
    grid = (pl.cdiv(total, tc),)
    out2d = pl.pallas_call(
        _copy_kernel,
        out_shape=jax.ShapeDtypeStruct((1, total), x.dtype),
        grid_spec=pltpu.PrefetchScalarGridSpec(
            num_scalar_prefetch=0,
            grid=grid,
            in_specs=[pl.BlockSpec((1, tc), lambda j: (0, j))],
            out_specs=pl.BlockSpec((1, tc), lambda j: (0, j)),
        ),
        compiler_params=compiler_params,
    )(x2d)
    return out2d.reshape(orig_shape)


if __name__ == "__main__":
    key = jax.random.PRNGKey(0)
    # Small shape consistent with an image-classifier input (NCHW).
    x = jax.random.normal(key, (2, 4, 16, 16), dtype=jnp.float32)

    # Primary path: no-op aliased identity.
    y = classifier_forward(x)
    y = jax.block_until_ready(y)
    assert y.shape == x.shape, (y.shape, x.shape)
    assert y.dtype == x.dtype, (y.dtype, x.dtype)
    assert bool(jnp.all(y == x)), "identity (no-op aliased) output mismatch"

    # Secondary path: materializing tiled copy.
    z = classifier_forward_copy(x)
    z = jax.block_until_ready(z)
    assert z.shape == x.shape, (z.shape, x.shape)
    assert z.dtype == x.dtype, (z.dtype, x.dtype)
    assert bool(jnp.all(z == x)), "identity (tiled copy) output mismatch"

    print("KERNEL_OK")
</pallas_src>

<mosaic_0001>
module attributes {stable_mosaic.version = 11 : i64} {
  func.func @_noop_kernel(%arg0: memref<2x4x16x16xf32, #tpu.memory_space<any>>, %arg1: memref<2x4x16x16xf32, #tpu.memory_space<any>>) attributes {dimension_semantics = [], scalar_prefetch = 0 : i64, scratch_operands = 0 : i64, tpu.core_type = #tpu.core_type<tc>} {
    return
  }
}

</mosaic_0001>

<bundles_post_ra>
// kernel: tpu_custom_call.1
= control target key start
LH: loop header
LB: loop body
LE: loop exit
PB: predicated region body
PF: predicated region fallthrough
CT: control target
= control target key end

     0   :  { %s16_s0 = inlined_call_operand.hbm [shape: f32[2,4,16,16], index: 0, kind: input, shape index: {}, may-alias: {0,1}]   ;;  %s17_s1 = inlined_call_operand.hbm [shape: f32[2,4,16,16], index: 1, kind: output, shape index: {}, may-alias: {0,1}]  }

</bundles_post_ra>
